<compile_context>
chip_gen: v6e
topology: v6e:2x2x1
jax: 0.10.0
libtpu: 0.0.40
codegen_flags: <defaults>
</compile_context>

<pallas_src>
import math

import jax
import jax.numpy as jnp
from jax.experimental import pallas as pl
from jax.experimental.pallas import tpu as pltpu


def _attention_kernel(x_ref, w1_ref, b1_ref, w2_ref, out_ref, attw_ref):
    tb, s, h = x_ref.shape
    h2 = w1_ref.shape[1]

    x = x_ref[...]                                    # (TB, S, H), bf16 (or f32)

    # First linear (H -> H/2) on the MXU, bf16 operands, f32 accumulation.
    if s % 8 == 0:
        # Layout-preserving flatten -> one big-M (TB*S, H) @ (H, H2) matmul.
        pre = jnp.dot(
            x.reshape(tb * s, h), w1_ref[...],
            preferred_element_type=jnp.float32,
        ).reshape(tb, s, h2)
    else:
        # S not 8-aligned: contract on the 3-D array so no relayout copy.
        pre = jax.lax.dot_general(
            x, w1_ref[...], (((2,), (0,)), ((), ())),
            preferred_element_type=jnp.float32,
        )
    hid = jnp.tanh(pre + b1_ref[...])                 # (TB, S, H2) f32, EUP tanh

    # Second linear (H/2 -> 1): VPU multiply + cross-lane reduce instead of an
    # N=1 MXU matmul.  b2 omitted (softmax shift-invariance).
    scores = jnp.sum(hid * w2_ref[...], axis=-1)      # (TB, S), S in lanes

    # Softmax over the sequence axis (lane reduce, EUP exp, exact normalize so
    # the returned weights sum to 1).
    m = jnp.max(scores, axis=-1, keepdims=True)       # (TB, 1)
    e = jnp.exp(scores - m)                           # (TB, S)
    wgt = e / jnp.sum(e, axis=-1, keepdims=True)      # (TB, S) f32

    attw_ref[...] = wgt.astype(attw_ref.dtype)        # lane-dense (TB, S) store

    # attended[t, :] = sum_s wgt[t, s] * x[t, s, :]
    # VPU weighted multiply + sublane reduce; does NOT touch the MXU, so it
    # overlaps with the projection matmul of the next rows.
    xf = x.astype(jnp.float32)
    attended = jnp.sum(wgt[:, :, None] * xf, axis=1)  # (TB, H) f32
    out_ref[...] = attended.astype(out_ref.dtype)


def _vmem_budget():
    """(x-tile byte target, scoped-VMEM limit) chosen per TPU generation."""
    try:
        vmem = int(pltpu.get_tpu_info().vmem_capacity_bytes)
    except Exception:
        vmem = 64 * 1024 * 1024  # conservative: v7x per-TensorCore VMEM
    if vmem >= 128 * 1024 * 1024:
        # v5e / v6e: 128 MiB VMEM -> big tiles amortize per-step overhead.
        return 12 * 1024 * 1024, 96 * 1024 * 1024
    # v7x: 64 MiB per TC -> keep double-buffered x + hid well inside it.
    return 6 * 1024 * 1024, 48 * 1024 * 1024


def _default_block_b(B, S, H, itemsize, bytes_target):
    """Pick the batch-block size TB (rows of x per grid step)."""
    row_bytes = S * H * itemsize
    tb = max(1, bytes_target // row_bytes)
    tb = min(tb, B)
    # v7x has 2 TensorCores sharing the ("parallel",) grid axis: aim for
    # >= 2 steps per core (>= 4 total) when the batch is large enough, and
    # >= 2 steps overall so DMA can hide behind compute.
    if B >= 32:
        tb = min(tb, pl.cdiv(B, 4))
    elif B >= 16 and tb >= B:
        tb = pl.cdiv(B, 2)
    if tb < B:
        # Output blocks carry TB as their second-minor dim: must be 8-aligned
        # unless the block spans the whole batch (full-extent is always legal).
        tb = max(8, (tb // 8) * 8)
        steps = pl.cdiv(B, tb)
        if steps > 1 and steps % 2 == 1:
            # Best-effort: one more step to even work across the two v7x TCs.
            alt = -(-pl.cdiv(B, steps + 1) // 8) * 8
            if alt >= 8 and pl.cdiv(B, alt) % 2 == 0:
                tb = alt
    return max(1, min(tb, B))


def simplified_temporal_attention(x, w1, b1, w2, b2=None, *, block_b=None,
                                  compute_dtype=jnp.bfloat16):
    """x: (B, S, H).  Returns (attended (B, H) f32, attention_weights (B, S) f32).

    b2 is accepted for interface parity with the PyTorch module but unused
    (softmax over the sequence axis is invariant to a scalar score bias).
    Dropout is identity (eval mode).  x and w1 are cast to `compute_dtype`
    (bf16 by default) so the dominant HBM stream is half-width.
    """
    B, S, H = x.shape
    H2 = w1.shape[1]
    assert w1.shape == (H, H2) and b1.shape == (1, H2)
    assert w2.shape == (H2, 1)

    x_c = x.astype(compute_dtype)
    w1_c = w1.astype(compute_dtype)
    b1_r = b1.reshape(1, H2).astype(jnp.float32)
    w2_row = w2.reshape(1, H2).astype(jnp.float32)   # row form: VPU mul + lane reduce

    bytes_target, vmem_limit = _vmem_budget()
    itemsize = jnp.dtype(compute_dtype).itemsize
    if block_b is None:
        block_b = _default_block_b(B, S, H, itemsize, bytes_target)
    block_b = min(block_b, B)
    grid = (pl.cdiv(B, block_b),)

    grid_spec = pltpu.PrefetchScalarGridSpec(
        num_scalar_prefetch=0,
        grid=grid,
        in_specs=[
            pl.BlockSpec((block_b, S, H), lambda i: (i, 0, 0)),  # x batch block
            pl.BlockSpec((H, H2), lambda i: (0, 0)),             # w1 (resident)
            pl.BlockSpec((1, H2), lambda i: (0, 0)),             # b1 (resident)
            pl.BlockSpec((1, H2), lambda i: (0, 0)),             # w2 row (resident)
        ],
        out_specs=[
            pl.BlockSpec((block_b, H), lambda i: (i, 0)),        # attended
            pl.BlockSpec((block_b, S), lambda i: (i, 0)),        # attention weights
        ],
    )

    cost = pl.CostEstimate(
        flops=int(2 * B * S * H * H2      # H -> H2 projection
                  + 2 * B * S * H2        # score multiply + reduce
                  + 2 * B * S * H         # weighted sum over S
                  + 5 * B * S),           # softmax bookkeeping
        transcendentals=int(B * S * (H2 + 1)),   # tanh + exp
        bytes_accessed=int(x_c.size * itemsize
                           + w1_c.size * itemsize
                           + (b1_r.size + w2_row.size) * 4
                           + (B * H + B * S) * 4),
    )

    attended, attn_w = pl.pallas_call(
        _attention_kernel,
        out_shape=(
            jax.ShapeDtypeStruct((B, H), jnp.float32),
            jax.ShapeDtypeStruct((B, S), jnp.float32),
        ),
        grid_spec=grid_spec,
        compiler_params=pltpu.CompilerParams(
            dimension_semantics=("parallel",),
            vmem_limit_bytes=vmem_limit,
        ),
        cost_estimate=cost,
    )(x_c, w1_c, b1_r, w2_row)
    return attended, attn_w


def _xavier_uniform(key, shape):
    fan_in, fan_out = shape[0], shape[1]
    limit = math.sqrt(6.0 / (fan_in + fan_out))
    return jax.random.uniform(key, shape, jnp.float32, -limit, limit)


def _reference(x, w1, b1, w2, b2):
    """Pure-JAX reference of the PyTorch forward (eval mode)."""
    h = jnp.tanh(x @ w1 + b1[0])            # (B, S, H2)
    scores = h @ w2 + b2[0]                 # (B, S, 1)
    w = jax.nn.softmax(scores, axis=1)      # softmax over seq dim
    attended = jnp.sum(w * x, axis=1)       # (B, H)
    return attended, w[..., 0]


if __name__ == "__main__":
    key = jax.random.PRNGKey(0)
    B, S, H = 2, 8, 32
    H2 = H // 2

    k_x, k_w1, k_w2 = jax.random.split(key, 3)
    x = jax.random.normal(k_x, (B, S, H), jnp.float32)

    # nn.Linear weights are (out, in) in PyTorch; we store the transposed
    # (in, out) form so the kernel does x @ w directly.  xavier_uniform is
    # symmetric in fan_in/fan_out, so initialization statistics match.
    w1 = _xavier_uniform(k_w1, (H, H2))
    b1 = jnp.zeros((1, H2), jnp.float32)
    w2 = _xavier_uniform(k_w2, (H2, 1))
    b2 = jnp.zeros((1, 1), jnp.float32)

    attended, attn_w = simplified_temporal_attention(x, w1, b1, w2, b2)
    jax.block_until_ready((attended, attn_w))

    assert attended.shape == (B, H)
    assert attn_w.shape == (B, S)

    # Reference on the bf16-quantized inputs the kernel actually consumes
    # (isolates kernel math from the intentional bf16 input quantization).
    x_q = x.astype(jnp.bfloat16).astype(jnp.float32)
    w1_q = w1.astype(jnp.bfloat16).astype(jnp.float32)
    ref_att_q, ref_w_q = _reference(x_q, w1_q, b1, w2, b2)
    assert jnp.allclose(attended, ref_att_q, atol=2e-3, rtol=2e-3)
    assert jnp.allclose(attn_w, ref_w_q, atol=2e-3, rtol=2e-3)

    # Exact softmax normalization (exact divide, no approx reciprocal).
    assert jnp.allclose(jnp.sum(attn_w, axis=-1), 1.0, atol=1e-5)

    # Sanity vs full-f32 reference: remaining error is bf16 input quantization.
    ref_att32, ref_w32 = _reference(x, w1, b1, w2, b2)
    assert jnp.allclose(attended, ref_att32, atol=5e-2, rtol=5e-2)
    assert jnp.allclose(attn_w, ref_w32, atol=5e-2, rtol=5e-2)

    print("KERNEL_OK")
</pallas_src>

<mosaic_0001>
module attributes {stable_mosaic.version = 11 : i64} {
  func.func @_attention_kernel(%arg0: i32, %arg1: memref<2x8x32xbf16, #tpu.memory_space<vmem>>, %arg2: memref<32x16xbf16, #tpu.memory_space<vmem>>, %arg3: memref<1x16xf32, #tpu.memory_space<vmem>>, %arg4: memref<1x16xf32, #tpu.memory_space<vmem>>, %arg5: memref<2x32xf32, #tpu.memory_space<vmem>>, %arg6: memref<2x8xf32, #tpu.memory_space<vmem>>) attributes {dimension_semantics = [#tpu.dimension_semantics<parallel>], iteration_bounds = array<i64: 1>, scalar_prefetch = 0 : i64, scratch_operands = 0 : i64, tpu.core_type = #tpu.core_type<tc>, window_params = [{transform_indices = @transform_0, window_bounds = array<i64: 2, 8, 32>}, {pipeline_mode = #tpu.pipeline_mode<synchronous>, transform_indices = @transform_1, window_bounds = array<i64: 32, 16>}, {pipeline_mode = #tpu.pipeline_mode<synchronous>, transform_indices = @transform_2, window_bounds = array<i64: 1, 16>}, {pipeline_mode = #tpu.pipeline_mode<synchronous>, transform_indices = @transform_3, window_bounds = array<i64: 1, 16>}, {transform_indices = @transform_4, window_bounds = array<i64: 2, 32>}, {transform_indices = @transform_5, window_bounds = array<i64: 2, 8>}]} {
    %c0 = arith.constant 0 : index
    %c0_0 = arith.constant 0 : index
    %c0_1 = arith.constant 0 : index
    %0 = vector.load %arg1[%c0, %c0_0, %c0_1] : memref<2x8x32xbf16, #tpu.memory_space<vmem>>, vector<2x8x32xbf16>
    %1 = vector.shape_cast %0 : vector<2x8x32xbf16> to vector<16x32xbf16>
    %c0_2 = arith.constant 0 : index
    %c0_3 = arith.constant 0 : index
    %2 = vector.load %arg2[%c0_2, %c0_3] : memref<32x16xbf16, #tpu.memory_space<vmem>>, vector<32x16xbf16>
    %cst = arith.constant dense<0.000000e+00> : vector<16x16xf32>
    %3 = tpu.matmul %1, %2, %cst {dimension_numbers = #tpu.dot_dimension_numbers<[1], [0], [0], [1], [0, 0, 1, 1], [], []>} : vector<16x32xbf16>, vector<32x16xbf16>, vector<16x16xf32> -> vector<16x16xf32>
    %4 = vector.shape_cast %3 : vector<16x16xf32> to vector<2x8x16xf32>
    %c0_4 = arith.constant 0 : index
    %c0_5 = arith.constant 0 : index
    %5 = vector.load %arg3[%c0_4, %c0_5] : memref<1x16xf32, #tpu.memory_space<vmem>>, vector<1x16xf32>
    %6 = vector.shape_cast %5 : vector<1x16xf32> to vector<1x1x16xf32>
    %7 = vector.broadcast %6 : vector<1x1x16xf32> to vector<2x8x16xf32>
    %8 = arith.addf %4, %7 : vector<2x8x16xf32>
    %9 = math.tanh %8 : vector<2x8x16xf32>
    %c0_6 = arith.constant 0 : index
    %c0_7 = arith.constant 0 : index
    %10 = vector.load %arg4[%c0_6, %c0_7] : memref<1x16xf32, #tpu.memory_space<vmem>>, vector<1x16xf32>
    %11 = vector.shape_cast %10 : vector<1x16xf32> to vector<1x1x16xf32>
    %12 = vector.broadcast %11 : vector<1x1x16xf32> to vector<2x8x16xf32>
    %13 = arith.mulf %9, %12 : vector<2x8x16xf32>
    %cst_8 = arith.constant dense<0.000000e+00> : vector<2x8xf32>
    %14 = vector.multi_reduction <add>, %13, %cst_8 [2] : vector<2x8x16xf32> to vector<2x8xf32>
    %cst_9 = arith.constant dense<0xFF800000> : vector<2xf32>
    %15 = vector.multi_reduction <maximumf>, %14, %cst_9 [1] : vector<2x8xf32> to vector<2xf32>
    %16 = vector.shape_cast %15 : vector<2xf32> to vector<2x1xf32>
    %17 = vector.broadcast %16 : vector<2x1xf32> to vector<2x8xf32>
    %18 = arith.subf %14, %17 : vector<2x8xf32>
    %19 = math.exp %18 : vector<2x8xf32>
    %cst_10 = arith.constant dense<0.000000e+00> : vector<2xf32>
    %20 = vector.multi_reduction <add>, %19, %cst_10 [1] : vector<2x8xf32> to vector<2xf32>
    %21 = vector.shape_cast %20 : vector<2xf32> to vector<2x1xf32>
    %22 = vector.broadcast %21 : vector<2x1xf32> to vector<2x8xf32>
    %23 = arith.divf %19, %22 : vector<2x8xf32>
    %c0_11 = arith.constant 0 : index
    %c0_12 = arith.constant 0 : index
    %24 = vector.load %arg6[%c0_11, %c0_12] : memref<2x8xf32, #tpu.memory_space<vmem>>, vector<2x8xf32>
    tpu.vector_store %arg6[%c0_11, %c0_12], %23 {strides = array<i32>} : memref<2x8xf32, #tpu.memory_space<vmem>>, vector<2x8xf32>,
    %25 = arith.extf %0 : vector<2x8x32xbf16> to vector<2x8x32xf32>
    %26 = vector.shape_cast %23 : vector<2x8xf32> to vector<2x8x1xf32>
    %27 = vector.broadcast %26 : vector<2x8x1xf32> to vector<2x8x32xf32>
    %28 = arith.mulf %27, %25 : vector<2x8x32xf32>
    %cst_13 = arith.constant dense<0.000000e+00> : vector<2x32xf32>
    %29 = vector.multi_reduction <add>, %28, %cst_13 [1] : vector<2x8x32xf32> to vector<2x32xf32>
    %c0_14 = arith.constant 0 : index
    %c0_15 = arith.constant 0 : index
    %30 = vector.load %arg5[%c0_14, %c0_15] : memref<2x32xf32, #tpu.memory_space<vmem>>, vector<2x32xf32>
    tpu.vector_store %arg5[%c0_14, %c0_15], %29 {strides = array<i32>} : memref<2x32xf32, #tpu.memory_space<vmem>>, vector<2x32xf32>,
    return
  }
  func.func @transform_0(%arg0: i32) -> (i32, i32, i32) {
    %c0_i32 = arith.constant 0 : i32
    %c0_i32_0 = arith.constant 0 : i32
    %c0_i32_1 = arith.constant 0 : i32
    return %arg0, %c0_i32, %c0_i32_0 : i32, i32, i32
  }
  func.func @transform_1(%arg0: i32) -> (i32, i32) {
    %c0_i32 = arith.constant 0 : i32
    %c0_i32_0 = arith.constant 0 : i32
    %c0_i32_1 = arith.constant 0 : i32
    return %c0_i32, %c0_i32_0 : i32, i32
  }
  func.func @transform_2(%arg0: i32) -> (i32, i32) {
    %c0_i32 = arith.constant 0 : i32
    %c0_i32_0 = arith.constant 0 : i32
    %c0_i32_1 = arith.constant 0 : i32
    return %c0_i32, %c0_i32_0 : i32, i32
  }
  func.func @transform_3(%arg0: i32) -> (i32, i32) {
    %c0_i32 = arith.constant 0 : i32
    %c0_i32_0 = arith.constant 0 : i32
    %c0_i32_1 = arith.constant 0 : i32
    return %c0_i32, %c0_i32_0 : i32, i32
  }
  func.func @transform_4(%arg0: i32) -> (i32, i32) {
    %c0_i32 = arith.constant 0 : i32
    %c0_i32_0 = arith.constant 0 : i32
    return %arg0, %c0_i32 : i32, i32
  }
  func.func @transform_5(%arg0: i32) -> (i32, i32) {
    %c0_i32 = arith.constant 0 : i32
    %c0_i32_0 = arith.constant 0 : i32
    return %arg0, %c0_i32 : i32, i32
  }
}

</mosaic_0001>

<bundles_post_ra>
// kernel: tpu_custom_call.1
= control target key start
LH: loop header
LB: loop body
LE: loop exit
PB: predicated region body
PF: predicated region fallthrough
CT: control target
= control target key end

     0   :  { %11 = vsyncpa [#allocation3], 0  ;;  %v346_v1 = vmov 0.0   ;;  %vm347_vm0 = vmmov 0   ;;  %s417_s0 = inlined_call_operand.vmem [shape: bf16[2,8,32], index: 0, kind: input, shape index: {}]   ;;  %s418_s1 = inlined_call_operand.vmem [shape: bf16[32,16], index: 1, kind: input, shape index: {}]   ;;  %s419_s2 = inlined_call_operand.vmem [shape: f32[1,16], index: 2, kind: input, shape index: {}]   ;;  %s420_s3 = inlined_call_operand.vmem [shape: f32[1,16], index: 3, kind: input, shape index: {}]   ;;  %s421_s4 = inlined_call_operand.hbm [shape: f32[2,32], index: 4, kind: output, shape index: {0}]   ;;  %s422_s5 = inlined_call_operand.hbm [shape: f32[2,8], index: 5, kind: output, shape index: {1}]  }
   0x1   :  { %v286_v0 = vld [vmem:[%s418_s1 + $0x8] sm:$0xff]   ;;  %271 = vmatprep.subr.bf16.mxu0 %v346_v1  ;;  %v287_v2 = vld [vmem:[%s418_s1] sm:$0xff]   ;;  %275 = vmatprep.mubr.msk.bf16.mxu0 %vm347_vm0, %v346_v1 }
   0x2   :  { %272 = vmatpush3.bf16.msra.mxu0 %v286_v0  ;;  %v390_v3 = vld [vmem:[%s417_s0] sm:$0xff]  }
   0x3   :  { %12 = vsyncpa [#allocation5], 0  ;;  %273 = vmatprep.subr.bf16.mxu0 %v346_v1  ;;  %vm45_vm1 = vcmask 261120   ;;  %v266_v4 = vld [vmem:[%s419_s2] ss:$0 sm:$0xff]  ;;  %vm110_vm2 = vcmask 130048   ;;  %v119_v18 = vlaneseq  ;;  %v208_v53 = vunpack.c.l.bf16 %v390_v3 }
   0x4   :  { %v267_v11 = vld [vmem:[%s420_s3] ss:$0 sm:$0xff]  ;;  %vm129_vm3 = vcmask 1041409   ;;  %vm132_vm4 = vcmask 58368   ;;  %v348_v28 = vmov 0   ;;  %v209_v56 = vunpack.c.h.bf16 %v390_v3  ;;  %s349_s2 = smov [#allocation4]  }
   0x5   :  { %v120_v19 = vand.u32 127, %v119_v18  ;;  %v122_v20 = vshrl.u32 %v119_v18, 7  ;;  %285 = vset.pattern.permute.xlu0 %v348_v28  ;;  %284 = vset.pattern.permute.xlu1 %v348_v28  ;;  %s250_s3 = sshll.u32 %s349_s2, 4  ;;  %s251_s3 = int_to_ptr.vmem [resolvable:$true] %s250_s3 }
   0x6   :  { %274 = vmatpush3.bf16.msra.mxu0 %v287_v2  ;;  %s302_s26 = scalar_lea.vmem %s251_s3, 32  ;;  %p307_p1 = scmp.lt.s32.totalorder %s251_s3, %s251_s3 }
   0x7   :  { %v123_v22 = vsub.s32 %v120_v19, %v122_v20  ;;  %v139_v29 = vsub.s32 0, %v122_v20  ;;  %v143_v30 = vsub.s32 1, %v122_v20  ;;  %p303_p0 = scmp.ne.s32.totalorder %s251_s3, %s302_s26  ;;  %p308_p2 = scmp.lt.s32.totalorder %s302_s26, %s302_s26 }
   0x9   :  { %276 = vmatmul.mubr.msk.bf16.vlgmr.msra.gmra.mxu0 %vm45_vm1, %v390_v3  ;;  %p309_p3 = por %p308_p2, %p307_p1 }
   0xb   :  { %p310_p4 = pnand %p309_p3, %p303_p0 }
  0xc9   :  { %v83_v5 = vpop.f32.mrf.mxu0 }
  0xca   :  { %v97_v6 = vadd.f32 %v266_v4, %v83_v5 }
  0xcb   :  { %v277_v7 = vpop.f32.mrf.mxu0 }
  0xcc   :  { %290 = vtanh.f32 %v97_v6 }
  0xcd   :  { %v86_v8 = vpop.f32.mrf.mxu0 }
  0xce   :  { %v98_v9 = vadd.f32 %v266_v4, %v86_v8 }
  0xcf   :  { %v278_v10 = vpop.f32.mrf.mxu0 }
  0xd0   :  { %292 = vtanh.f32 %v98_v9 }
  0xd9   :  { %v291_v12 = vpop.eup %290 }
  0xda   :  { %v108_v13 = vmul.f32 %v291_v12, %v267_v11 }
  0xdc   :  { %v111_v14 = vsel %vm110_vm2, %v108_v13, 0.0 }
  0xdd   :  { %v293_v15 = vpop.eup %292  ;;  %112 = vadd.xlane.f32.xlu0 %v111_v14 }
  0xde   :  { %v109_v16 = vmul.f32 %v293_v15, %v267_v11 }
  0xe0   :  { %v114_v17 = vsel %vm110_vm2, %v109_v16, 0.0 }
  0xe1   :  { %115 = vadd.xlane.f32.xlu0 %v114_v17 }
 0x166   :  { %v113_v21 = vpop.xlane.xlu0 %112 }
 0x167   :  { %v124_v24 = vrot.slane %v113_v21, %v123_v22 }
 0x16a   :  { %v116_v23 = vpop.xlane.xlu0 %115 }
 0x16b   :  { %v128_v25 = vrot.slane %v116_v23, %v123_v22 }
 0x16d   :  { %v130_v26 = vsel %vm129_vm3, %v128_v25, %v124_v24 }
 0x16e   :  { %v133_v27 = vsel %vm132_vm4, %v130_v26, -inf }
 0x16f   :  { %134 = vmax.xlane.f32.xlu1 %v133_v27 }
 0x1f8   :  { %v135_v31 = vpop.xlane.xlu1 %134 }
 0x1f9   :  { %v140_v32 = vrot.slane %v135_v31, %v139_v29  ;;  %v144_v33 = vrot.slane %v135_v31, %v143_v30 }
 0x1fb   :  { %v147_v34 = vsub.f32 %v113_v21, %v140_v32  ;;  %v148_v35 = vsub.f32 %v116_v23, %v144_v33 }
 0x1fd   :  { %v149_v36 = vmul.f32 1.442695, %v147_v34  ;;  %v151_v37 = vmul.f32 1.442695, %v148_v35 }
 0x1ff   :  { %294 = vpow2.f32 %v149_v36 }
 0x200   :  { %296 = vpow2.f32 %v151_v37 }
 0x20c   :  { %v295_v38 = vpop.eup %294 }
 0x20d   :  { %v297_v39 = vpop.eup %296  ;;  %156 = vperm.xlu1 %284, %v295_v38  }
 0x20e   :  { %159 = vperm.xlu0 %285, %v297_v39  }
 0x288   :  { %v157_v40 = vpop.permute.xlu1 %156 }
 0x289   :  { %v160_v41 = vpop.permute.xlu0 %159  ;;  %v164_v42 = vrot.slane %v157_v40, %v123_v22 }
 0x28a   :  { %v168_v43 = vrot.slane %v160_v41, %v123_v22 }
 0x28c   :  { %v169_v44 = vsel %vm129_vm3, %v168_v43, %v164_v42 }
 0x28d   :  { %v171_v45 = vsel %vm132_vm4, %v169_v44, 0.0 }
 0x28e   :  { %172 = vadd.xlane.f32.xlu1 %v171_v45 }
 0x317   :  { %v173_v46 = vpop.xlane.xlu1 %172 }
 0x318   :  { %v178_v47 = vrot.slane %v173_v46, %v139_v29  ;;  %v182_v48 = vrot.slane %v173_v46, %v143_v30 }
 0x31a   :  { %298 = vrcp.f32 %v178_v47 }
 0x31b   :  { %300 = vrcp.f32 %v182_v48 }
 0x327   :  { %v299_v49 = vpop.eup %298 }
 0x328   :  { %v186_v50 = vmul.f32 %v299_v49, %v295_v38  ;;  %v301_v51 = vpop.eup %300 }
 0x329   :  { %v188_v52 = vmul.f32 %v301_v51, %v297_v39 }
 0x32a   :  { %192 = vperm.xlu0 %285, %v186_v50  }
 0x32e   :  { %195 = vperm.xlu0 %285, %v188_v52  }
 0x3a5   :  { %v193_v54 = vpop.permute.xlu0 %192 }
 0x3a6   :  { %v212_v55 = vmul.f32 %v208_v53, %v193_v54  ;;  %v200_v60 = vrot.slane %v193_v54, %v123_v22 }
 0x3a8   :  { %v214_v57 = vsel %vm45_vm1, %v212_v55, 0.0 }
 0x3a9   :  { %v215_v58 = vrot.slane %v214_v57, 4  ;;  %v196_v59 = vpop.permute.xlu0 %195 }
 0x3aa   :  { %v204_v61 = vrot.slane %v196_v59, %v123_v22  ;;  %v213_v62 = vmul.f32 %v209_v56, %v196_v59 }
 0x3ab   :  { %v216_v63 = vadd.f32 %v215_v58, %v214_v57 }
 0x3ac   :  { %v221_v0 = vsel %vm45_vm1, %v213_v62, 0.0  ;;  %v205_v1 = vsel %vm129_vm3, %v204_v61, %v200_v60 }
 0x3ad   :  { %v217_v2 = vrot.slane %v216_v63, 2  ;;  %v222_v4 = vrot.slane %v221_v0, 4  ;;  %207 = vst.msk [vmem:[#allocation4] sm:$0x3] %vm132_vm4, %v205_v1 }
 0x3ae   :  { %313 = shalt.err (!%p310_p4)
}
 0x3af   :  { %253 = dma.vmem_to_hbm [thread:$0]  %s251_s3, 32, %s422_s5, [#allocation5]   ;;  %v218_v3 = vadd.f32 %v217_v2, %v216_v63  ;;  %v223_v5 = vadd.f32 %v222_v4, %v221_v0  ;;  %vm232_vm5 = vcmask 254976  }
 0x3b0   :  { %s350_s29 = smov [#allocation2]  }
 0x3b1   :  { %v224_v6 = vrot.slane %v223_v5, 2  ;;  %v219_v8 = vrot.slane %v218_v3, 1  ;;  %s240_s30 = sshll.u32 %s350_s29, 4  ;;  %s241_s30 = int_to_ptr.vmem [resolvable:$true] %s240_s30 }
 0x3b2   :  { %s322_s6 = scalar_lea.vmem %s241_s30, 32  ;;  %p327_p6 = scmp.lt.s32.totalorder %s241_s30, %s241_s30 }
 0x3b3   :  { %v225_v7 = vadd.f32 %v224_v6, %v223_v5  ;;  %v220_v10 = vadd.f32 %v219_v8, %v218_v3  ;;  %p323_p5 = scmp.ne.s32.totalorder %s241_s30, %s322_s6  ;;  %p328_p7 = scmp.lt.s32.totalorder %s322_s6, %s322_s6 }
 0x3b5   :  { %v226_v9 = vrot.slane %v225_v7, 1  ;;  %p329_p8 = por %p328_p7, %p327_p6 }
 0x3b7   :  { %v227_v11 = vadd.f32 %v226_v9, %v225_v7  ;;  %p330_p9 = pnand %p329_p8, %p323_p5 }
 0x3b9   :  { %v230_v12 = vsel %vm129_vm3, %v227_v11, %v220_v10 }
 0x3ba   :  { %233 = vst.msk [vmem:[#allocation2] sm:$0x3] %vm232_vm5, %v230_v12 }
 0x3bb   :  { %333 = shalt.err (!%p330_p9)
}
 0x3bc   :  { %243 = dma.vmem_to_hbm [thread:$0]  %s241_s30, 32, %s421_s4, [#allocation3]  }
 0x3bd   :  { %342 = dma.done.wait [#allocation3], 32  }
 0x3be   :  { %343 = vsyncadd [#allocation3], 4294967264 }
 0x3bf   :  { %344 = dma.done.wait [#allocation5], 32  }
 0x3c0   :  { %345 = vsyncadd [#allocation5], 4294967264 }
 0x3c1   :  { %260 = vsyncpa [#allocation3], 1 }
 0x3c2   :  { %261 = vsyncpa [#allocation5], 1 }

</bundles_post_ra>
